<compile_context>
chip_gen: v5e
topology: v5e:2x2
jax: 0.10.0
libtpu: 0.0.40
codegen_flags: <defaults>
</compile_context>

<pallas_src>
import functools

import jax
import jax.numpy as jnp
from jax.experimental import pallas as pl
from jax.experimental.pallas import tpu as pltpu


def _normalize_kernel(scale_ref, bias_ref, x_ref, o_ref, *, rows_blk: int):
    # scale_ref, bias_ref: resident (R_pad, 1) f32 columns (one entry per (n, c) row)
    # x_ref:               (rows_blk, col_blk) tile in the input's native dtype
    # o_ref:               (rows_blk, col_blk) tile in the output dtype
    if scale_ref.shape[0] == rows_blk:
        sc = scale_ref[...]
        bs = bias_ref[...]
    else:
        # rows_blk < R only ever happens with rows_blk a multiple of 8.
        r0 = pl.multiple_of(pl.program_id(0) * rows_blk, 8)
        sc = scale_ref[pl.ds(r0, rows_blk), :]
        bs = bias_ref[pl.ds(r0, rows_blk), :]
    xf = x_ref[...].astype(jnp.float32)                    # in-kernel cast: free VPU filler
    o_ref[...] = (xf * sc + bs).astype(o_ref.dtype)        # fused (x - m)/s as x*scale + bias


def normalize(x: jax.Array, mean, std, *, out_dtype=None) -> jax.Array:
    """(x - mean[c]) / std[c] for NCHW input, matching the PyTorch Normalize module."""
    N, C, H, W = x.shape
    mean_arr = jnp.asarray(mean, dtype=jnp.float32)
    std_arr = jnp.asarray(std, dtype=jnp.float32)
    assert mean_arr.shape == (C,) and std_arr.shape == (C,)

    if out_dtype is None:
        # Preserve the input's floating dtype (halves HBM writes for bf16/f16).
        # Use out_dtype=jnp.float32 for PyTorch's exact f32-promotion behavior.
        out_dtype = x.dtype if jnp.issubdtype(x.dtype, jnp.floating) else jnp.float32
    out_dtype = jnp.dtype(out_dtype)

    # FMA constants: (x - m) / s == x * (1/s) + (-m/s)
    scale = 1.0 / std_arr                                  # (C,)
    bias = -mean_arr * scale                               # (C,)

    R = N * C                                              # one row per (n, c) slab
    L = H * W                                              # lane-dense spatial extent
    x2 = x.reshape(R, L)                                   # free view for contiguous NCHW

    in_itemsize = jnp.dtype(x.dtype).itemsize
    out_itemsize = out_dtype.itemsize

    # ---- Per-generation VMEM budget (live = 2x dbl-buffered in + 2x dbl-buffered out) ----
    try:
        physical_vmem = int(pltpu.get_tpu_info().vmem_capacity_bytes)
    except Exception:
        physical_vmem = 64 * 1024 * 1024                   # v7x per-TC (smallest current gen)
    pipeline_budget = min(physical_vmem // 2, 48 * 1024 * 1024)
    elems_budget = pipeline_budget // (2 * (in_itemsize + out_itemsize))
    # Also cap the x block at ~8 MiB: per-step HBM time then dwarfs the ~0.35 us overhead.
    elems_target = max(1, min(elems_budget, (8 * 1024 * 1024) // in_itemsize))

    # ---- Block shape -----------------------------------------------------------------
    total_elems = R * L
    if total_elems <= elems_target:
        rows_blk, col_blk = R, L
    elif 8 * L > elems_target:
        # Even 8 full-width rows overflow the budget: tile the lane axis too.
        rows_blk = min(R, 8)
        col_blk = min(L, max(128, (elems_target // rows_blk // 128) * 128))
    else:
        col_blk = L
        rows_target = elems_target // L
        rows_blk = min(R, max(8, (rows_target // 8) * 8))

    # Guarantee >= 2 grid steps when possible so both v7x TensorCores get work.
    if pl.cdiv(R, rows_blk) * pl.cdiv(L, col_blk) < 2:
        if R >= 16:
            rows_blk = min(rows_blk, ((pl.cdiv(R, 2) + 7) // 8) * 8)
        elif L >= 256:
            col_blk = min(col_blk, ((pl.cdiv(L, 2) + 127) // 128) * 128)
        # else: input is tiny; a single step is fine.

    grid = (pl.cdiv(R, rows_blk), pl.cdiv(L, col_blk))

    # Per-row scale/bias, padded so the in-kernel pl.ds slice of the resident block
    # never reads out of bounds on a ragged last row-block.
    R_pad = grid[0] * rows_blk
    scale_rows = jnp.tile(scale, N)                        # (R,) — c fastest, matches reshape
    bias_rows = jnp.tile(bias, N)
    if R_pad > R:
        scale_rows = jnp.pad(scale_rows, (0, R_pad - R), constant_values=1.0)
        bias_rows = jnp.pad(bias_rows, (0, R_pad - R), constant_values=0.0)
    scale_rows = scale_rows.reshape(R_pad, 1)
    bias_rows = bias_rows.reshape(R_pad, 1)

    # ---- Explicit VMEM limit with ~25% headroom ----------------------------------------
    blk = rows_blk * col_blk
    live_bytes = 2 * blk * in_itemsize + 2 * blk * out_itemsize
    live_bytes += 2 * 2 * pl.cdiv(R_pad, 8) * 4096         # resident scale/bias (vreg-padded)
    vmem_limit = int(live_bytes * 1.25) + (1 << 20)
    vmem_limit = max(vmem_limit, 16 * 1024 * 1024)
    vmem_limit = min(vmem_limit, int(physical_vmem * 0.9))

    kernel = functools.partial(_normalize_kernel, rows_blk=rows_blk)

    out2 = pl.pallas_call(
        kernel,
        out_shape=jax.ShapeDtypeStruct((R, L), out_dtype),
        grid=grid,
        in_specs=[
            pl.BlockSpec((R_pad, 1), lambda i, j: (0, 0)),          # scale (resident)
            pl.BlockSpec((R_pad, 1), lambda i, j: (0, 0)),          # bias  (resident)
            pl.BlockSpec((rows_blk, col_blk), lambda i, j: (i, j)),  # x (native dtype)
        ],
        out_specs=pl.BlockSpec((rows_blk, col_blk), lambda i, j: (i, j)),
        compiler_params=pltpu.CompilerParams(
            dimension_semantics=("parallel", "parallel"),
            vmem_limit_bytes=vmem_limit,
        ),
    )(scale_rows, bias_rows, x2)

    return out2.reshape(N, C, H, W)


if __name__ == "__main__":
    key = jax.random.PRNGKey(0)
    N, C, H, W = 2, 4, 16, 16
    x = jax.random.uniform(key, (N, C, H, W), dtype=jnp.float32)

    # Deterministic per-channel mean/std (module __init__ args).
    mean = tuple(0.1 * (i + 1) for i in range(C))   # (0.1, 0.2, 0.3, 0.4)
    std = tuple(0.5 + 0.1 * i for i in range(C))    # (0.5, 0.6, 0.7, 0.8)

    out = normalize(x, mean, std)
    jax.block_until_ready(out)

    # Reference check against plain-JAX broadcasting semantics.
    ref = (x - jnp.asarray(mean, jnp.float32)[None, :, None, None]) / \
          jnp.asarray(std, jnp.float32)[None, :, None, None]
    assert out.shape == (N, C, H, W) and out.dtype == jnp.float32
    assert jnp.allclose(out, ref, atol=1e-5, rtol=1e-5)

    print("KERNEL_OK")
</pallas_src>

<mosaic_0001>
module attributes {stable_mosaic.version = 11 : i64} {
  func.func @_normalize_kernel(%arg0: i32, %arg1: i32, %arg2: memref<8x1xf32, #tpu.memory_space<vmem>>, %arg3: memref<8x1xf32, #tpu.memory_space<vmem>>, %arg4: memref<8x128xf32, #tpu.memory_space<vmem>>, %arg5: memref<8x128xf32, #tpu.memory_space<vmem>>) attributes {dimension_semantics = [#tpu.dimension_semantics<parallel>, #tpu.dimension_semantics<parallel>], iteration_bounds = array<i64: 1, 2>, scalar_prefetch = 0 : i64, scratch_operands = 0 : i64, tpu.core_type = #tpu.core_type<tc>, window_params = [{pipeline_mode = #tpu.pipeline_mode<synchronous>, transform_indices = @transform_0, window_bounds = array<i64: 8, 1>}, {pipeline_mode = #tpu.pipeline_mode<synchronous>, transform_indices = @transform_1, window_bounds = array<i64: 8, 1>}, {transform_indices = @transform_2, window_bounds = array<i64: 8, 128>}, {transform_indices = @transform_3, window_bounds = array<i64: 8, 128>}]} {
    %c0 = arith.constant 0 : index
    %c0_0 = arith.constant 0 : index
    %0 = vector.load %arg2[%c0, %c0_0] : memref<8x1xf32, #tpu.memory_space<vmem>>, vector<8x1xf32>
    %c0_1 = arith.constant 0 : index
    %c0_2 = arith.constant 0 : index
    %1 = vector.load %arg3[%c0_1, %c0_2] : memref<8x1xf32, #tpu.memory_space<vmem>>, vector<8x1xf32>
    %c0_3 = arith.constant 0 : index
    %c0_4 = arith.constant 0 : index
    %2 = vector.load %arg4[%c0_3, %c0_4] : memref<8x128xf32, #tpu.memory_space<vmem>>, vector<8x128xf32>
    %3 = vector.broadcast %0 : vector<8x1xf32> to vector<8x128xf32>
    %4 = arith.mulf %2, %3 : vector<8x128xf32>
    %5 = vector.broadcast %1 : vector<8x1xf32> to vector<8x128xf32>
    %6 = arith.addf %4, %5 : vector<8x128xf32>
    %c0_5 = arith.constant 0 : index
    %c0_6 = arith.constant 0 : index
    %7 = vector.load %arg5[%c0_5, %c0_6] : memref<8x128xf32, #tpu.memory_space<vmem>>, vector<8x128xf32>
    tpu.vector_store %arg5[%c0_5, %c0_6], %6 {strides = array<i32>} : memref<8x128xf32, #tpu.memory_space<vmem>>, vector<8x128xf32>,
    return
  }
  func.func @transform_0(%arg0: i32, %arg1: i32) -> (i32, i32) {
    %c0_i32 = arith.constant 0 : i32
    %c0_i32_0 = arith.constant 0 : i32
    %c0_i32_1 = arith.constant 0 : i32
    return %c0_i32, %c0_i32_0 : i32, i32
  }
  func.func @transform_1(%arg0: i32, %arg1: i32) -> (i32, i32) {
    %c0_i32 = arith.constant 0 : i32
    %c0_i32_0 = arith.constant 0 : i32
    %c0_i32_1 = arith.constant 0 : i32
    return %c0_i32, %c0_i32_0 : i32, i32
  }
  func.func @transform_2(%arg0: i32, %arg1: i32) -> (i32, i32) {
    %c0_i32 = arith.constant 0 : i32
    return %arg0, %arg1 : i32, i32
  }
  func.func @transform_3(%arg0: i32, %arg1: i32) -> (i32, i32) {
    %c0_i32 = arith.constant 0 : i32
    return %arg0, %arg1 : i32, i32
  }
}

</mosaic_0001>

<bundles_post_ra>
// kernel: tpu_custom_call.1
= control target key start
LH: loop header
LB: loop body
LE: loop exit
PB: predicated region body
PF: predicated region fallthrough
CT: control target
= control target key end

     0   :  { %8 = vsyncpa [#allocation3], 0  ;;  %s575_s0 = inlined_call_operand.vmem [shape: f32[8,1], index: 0, kind: input, shape index: {}]   ;;  %s576_s1 = inlined_call_operand.vmem [shape: f32[8,1], index: 1, kind: input, shape index: {}]   ;;  %s577_s2 = inlined_call_operand.vmem [shape: f32[8,256], index: 2, kind: input, shape index: {}]   ;;  %s578_s3 = inlined_call_operand.hbm [shape: f32[8,256], index: 3, kind: output, shape index: {}]  }
   0x1   :  { %10 = vsyncpa [#allocation3 + $0x1], 0  ;;  %s472_s12 = smov 0   ;;  %s474_s13 = smov 0  }
   0x2   :  { %s476_s14 = smov 0   ;;  %s478_s15 = smov 0  }
   0x3   :  { %s480_s16 = smov 0   ;;  %s482_s17 = smov 0  }
   0x4 LB: > { %s303_s18 = sadd.s32 4294967295, %s449_s17   ;;  %s304_s19 = sadd.s32 4294967294, %s449_s17   ;;  %s449_s17 = sphi %s482_s17, %s16_s17   ;;  %s445_s16 = sphi %s480_s16, %s585_s16   ;;  %s441_s15 = sphi %s478_s15, %s584_s15   ;;  %s437_s14 = sphi %s476_s14, %s583_s14   ;;  %s433_s13 = sphi %s474_s13, %s582_s13   ;;  %s429_s12 = sphi %s472_s12, %s581_s12  }
   0x5   : > { %s25_s20 = sadd.s32 1, %s445_s16  ;;  %s107_s21 = sadd.s32 1, %s437_s14 }
   0x6   : > { %p26_p0 = scmp.ge.s32.totalorder %s25_s20, 2  ;;  %p117_p1 = scmp.ne.s32.totalorder %s437_s14, %s433_s13 }
   0x7   : > { %p118_p2 = scmp.eq.s32.totalorder %s303_s18, 1  ;;  %p123_p3 = scmp.ne.s32.totalorder %s433_s13, %s429_s12 }
   0x8   : > { %s587_s20 = smov (%p26_p0, %s25_s20), 0  ;;  %p124_p5 = scmp.eq.s32.totalorder %s304_s19, 1 }
   0x9   : > { %p512_p4 = por %p118_p2, %p117_p1  ;;  %s103_s23 = ssub.s32 %s445_s16, %s587_s20 }
   0xa   : > { %p307_p6 = scmp.ge.s32.totalorder %s449_s17, 1  ;;  %p105_p7 = scmp.eq.s32.totalorder %s103_s23, 0 }
   0xb   : > { %p519_p8 = por %p124_p5, %p123_p3  ;;  %p159_p9 = scmp.lt.s32.totalorder %s449_s17, 3 }
   0xc   : > { %s525_s25 = scalar_select %p105_p7, %s437_s14, %s107_s21  }
   0xd   : > { %p160_p10 = pnand %p307_p6, %p159_p9 }
   0xe   : > { %p188_p11 = scmp.lt.s32.totalorder (!%p160_p10), %s441_s15, 1  ;;  %s183_s4 = sand.u32 (!%p160_p10), 1, %s433_s13  }
   0xf   : > { %163 = sbr.rel (%p160_p10) target bundleno = 150 (0x96), region = 32  ;;  %s308_s6 = sshll.u32 (!%p160_p10), %s183_s4, 3 }
  0x10   : > { %s311_s7 = sshll.u32 (!%p160_p10), %s441_s15, 3  ;;  %s185_s21 = scalar_lea.vmem (!%p160_p10), [#allocation2], %s308_s6 }
  0x11   : > { %s223_s19 = scalar_lea.hbm (!%p160_p10), %s578_s3, %s311_s7  ;;  %s225_s23 = sshll.u32 (!%p160_p10), %s185_s21, 4  ;;  %s226_s23 = int_to_ptr.vmem [resolvable:$true] %s225_s23 }
  0x12   : > { %s227_s26 = sshll.u32 (!%p160_p10), %s223_s19, 4  ;;  %s228_s26 = int_to_ptr.hbm [resolvable:$true] %s227_s26 }
  0x13   : > { %s385_s27 = sshra.s32 (!%p160_p10), %s228_s26, 4  ;;  %s386_s27 = int_to_ptr.hbm [resolvable:$true] %s385_s27 }
  0x14   : > { %v194_v0 = vld [vmem:[%s575_s0] sm:$0xff]  ;;  %v451_v1 = vmov 0   ;;  %s189_s30 = scalar_select %p188_p11, %s441_s15, 1 }
  0x15   : > { %370 = vset.pattern.permute.xlu0 %v451_v1  ;;  %v195_v2 = vld [vmem:[%s576_s1] sm:$0xff]  ;;  %s211_s15 = scalar_lea.sflag [#allocation3], %s183_s4  ;;  %s387_s28 = scalar_lea.hbm %s386_s27, 8 }
  0x16   : > { %199 = vperm.xlu0 %370, %v194_v0   ;;  %s309_s5 = sshll.u32 %s189_s30, 3  ;;  %p388_p12 = scmp.ne.s32.totalorder %s386_s27, %s387_s28 }
  0x17   : > { %s193_s10 = scalar_lea.vmem %s577_s2, %s309_s5  ;;  %s391_s5 = scalar_lea.hbm %s578_s3, 16 }
  0x18   : > { %v196_v4 = vld [vmem:[%s193_s10] sm:$0xff]  ;;  %p389_p13 = pnand %p388_p12, %p512_p4  ;;  %p392_p1 = scmp.lt.s32.totalorder %s386_s27, %s578_s3 }
  0x19   : > { %p393_p2 = scmp.lt.s32.totalorder %s391_s5, %s387_s28 }
  0x1a   : > { %p390_p0 = pneg %p389_p13 }
  0x1b   : > { %p394_p3 = por %p393_p2, %p392_p1 }
  0x1d   : > { %p395_p5 = pnand %p394_p3, %p390_p0 }
  0x1e   : > { %205 = vperm.xlu0 %370, %v195_v2  }
  0x88   : > { %v200_v3 = vpop.permute.xlu0 %199 }
  0x89   : > { %v202_v5 = vmul.f32 %v200_v3, %v196_v4 }
  0x90   : > { %v206_v6 = vpop.permute.xlu0 %205 }
  0x91   : > { %v208_v7 = vadd.f32 %v206_v6, %v202_v5 }
  0x93   : > { %209 = vst [vmem:[%s185_s21] sm:$0xff] %v208_v7 }
  0x94   : > { %398 = shalt.err (!%p395_p5)
}
  0x95   : > { %314 = dma.vmem_to_hbm [thread:$0]  (%p512_p4), %s226_s23, 128, %s228_s26, %s211_s15  }
  0x96 PF: > { %p320_p6 = scmp.ge.s32.totalorder %s449_s17, 2  ;;  %s239_s4 = sand.u32 1, %s429_s12  }
  0x97   : > { %s240_s8 = scalar_lea.sflag [#allocation3], %s239_s4 }
  0x98   : > { %p317_p7 = pnand %p320_p6, %p519_p8 }
  0x9a   : > { %p318_p9 = pneg %p317_p7 }
  0x9c   : > { %424 = dma.done.wait (%p318_p9), %s240_s8, 128  }
  0x9d   : > { %426 = vsyncadd (%p318_p9), %s240_s8, 4294967168  ;;  %s16_s17 = sadd.s32 1, %s449_s17   ;;  %s581_s12 = smov %s433_s13 }
  0x9e   : > { %p13_p10 = scmp.ge.s32.totalorder %s16_s17, 4   ;;  %s582_s13 = smov %s437_s14 }
  0x9f   : > { %s583_s14 = smov %s525_s25  ;;  %s584_s15 = smov %s445_s16 }
  0xa0   : > { %s585_s16 = smov %s587_s20  ;;  %15 = sbr.rel (!%p13_p10) target bundleno = 4 (0x4), region = 67 }
  0xa5   :  { %246 = vsyncpa [#allocation3], 1 }
  0xa6   :  { %248 = vsyncpa [#allocation3 + $0x1], 1 }

</bundles_post_ra>
